<compile_context>
chip_gen: v7x
topology: tpu7x:2x2x1
jax: 0.10.0
libtpu: 0.0.40
codegen_flags: <defaults>
</compile_context>

<pallas_src>
import functools

import jax
import jax.numpy as jnp
from jax.experimental import pallas as pl
from jax.experimental.pallas import tpu as pltpu

_N_CORES = 2  # leading "parallel" grid axis (uses both TCs on v7x; harmless elsewhere)


def _distmult_kernel(h_ref, r_ref, t_ref, y_ref, out_ref, sq_acc, sp_acc,
                     *, batch, tb, blocks_per_core, needs_mask):
    c = pl.program_id(0)           # core-split index ("parallel")
    i = pl.program_id(1)           # batch-block index within this core ("arbitrary")

    @pl.when(i == 0)
    def _():
        sq_acc[...] = jnp.zeros_like(sq_acc)
        sp_acc[...] = jnp.zeros_like(sp_acc)

    h = h_ref[...]
    r = r_ref[...]
    t = t_ref[...]
    d = h.shape[-1]

    # Fused regularizer partial: sum over rows of (h^2 + t^2 + r^2), kept as an
    # (8, D) vector accumulator -> only vreg adds in the steady state.
    sq = h * h + t * t + r * r
    sq_acc[...] += jnp.sum(sq.reshape(tb // 8, 8, d), axis=0)

    # score = -sum(h * t * r, -1)  -> (tb, 1)   (the only per-step lane reduce)
    score = -jnp.sum(h * t * r, axis=-1, keepdims=True)

    # y is resident in VMEM; slice this block's rows (no per-step DMA).
    blk = c * blocks_per_core + i
    start = pl.multiple_of(blk * tb, 8)
    yb = y_ref[pl.ds(start, tb), :]                          # (tb, 1)

    # numerically stable softplus(score * y)
    x = score * yb
    sp = jnp.maximum(x, 0.0) + jnp.log1p(jnp.exp(-jnp.abs(x)))

    if needs_mask:  # only traced when the batch was zero-padded (tail tile)
        row = blk * tb + jax.lax.broadcasted_iota(jnp.int32, (tb, 1), 0)
        sp = jnp.where(row < batch, sp, 0.0)

    sp_acc[...] += jnp.sum(sp.reshape(tb // 8, 8, 1), axis=0)

    # Epilogue (once per core sweep): collapse the vector partials and emit
    # {softplus_sum, square_sum} for this core; final combine is in the wrapper.
    @pl.when(i == blocks_per_core - 1)
    def _():
        sp_sum = jnp.sum(sp_acc[...])
        sq_sum = jnp.sum(sq_acc[...])
        lane = jax.lax.broadcasted_iota(jnp.int32, (1, 8, 128), 2)
        out_ref[...] = jnp.where(lane == 0, sp_sum,
                                 jnp.where(lane == 1, sq_sum, 0.0))


def distmult_loss(h, r, t, y, *, lmbda=0.01, tb=None):
    """Pallas implementation of DistMult.forward((h, r, t, y))."""
    B, D = h.shape
    h = h.astype(jnp.float32)
    r = r.astype(jnp.float32)
    t = t.astype(jnp.float32)
    y = y.astype(jnp.float32)

    # --- batch-tile selection: HBM-bound kernel, so pick the largest tile whose
    # double-buffered embedding streams (3 inputs x 2 buffers x tb x D x 4B) stay
    # well inside VMEM (budget sized for v7x's 64 MiB physical / 32 MiB scoped).
    if tb is None:
        emb_budget = 24 << 20
        tb = emb_budget // (3 * 2 * D * 4)
        tb = min(tb, 2048)              # gains flatten out past ~1-2K rows
    half = -(-B // _N_CORES)            # never tile past the per-core batch
    tb = min(max(8, (tb // 8) * 8), ((half + 7) // 8) * 8)
    tb = max(tb, 8)

    chunk = _N_CORES * tb
    Bp = -(-B // chunk) * chunk         # pad batch to a full (2, blocks) grid
    pad = Bp - B
    if pad:
        h = jnp.pad(h, ((0, pad), (0, 0)))
        r = jnp.pad(r, ((0, pad), (0, 0)))
        t = jnp.pad(t, ((0, pad), (0, 0)))
        y = jnp.pad(y, (0, pad))
    y2 = y.reshape(Bp, 1)
    blocks_per_core = Bp // chunk

    kernel = functools.partial(
        _distmult_kernel, batch=B, tb=tb,
        blocks_per_core=blocks_per_core, needs_mask=(pad != 0))

    emb_spec = pl.BlockSpec((tb, D), lambda c, i: (c * blocks_per_core + i, 0))
    y_spec = pl.BlockSpec((Bp, 1), lambda c, i: (0, 0))        # resident, one DMA
    out_spec = pl.BlockSpec((1, 8, 128), lambda c, i: (c, 0, 0))

    # VMEM estimate: double-buffered embedding tiles + lane-padded resident y + scratch.
    vmem_need = 3 * 2 * tb * D * 4 + 2 * Bp * 512 + 8 * max(D, 128) * 4 + (4 << 20)
    vmem_limit = int(min(max(vmem_need, 32 << 20), 48 << 20))

    out = pl.pallas_call(
        kernel,
        out_shape=jax.ShapeDtypeStruct((_N_CORES, 8, 128), jnp.float32),
        grid_spec=pltpu.PrefetchScalarGridSpec(
            num_scalar_prefetch=0,
            grid=(_N_CORES, blocks_per_core),
            in_specs=[emb_spec, emb_spec, emb_spec, y_spec],
            out_specs=out_spec,
            scratch_shapes=[pltpu.VMEM((8, D), jnp.float32),
                            pltpu.VMEM((8, 1), jnp.float32)],
        ),
        compiler_params=pltpu.CompilerParams(
            dimension_semantics=("parallel", "arbitrary"),
            vmem_limit_bytes=vmem_limit,
        ),
    )(h, r, t, y2)

    # Tiny final combine of the per-core partials (done in XLA).
    sp_sum = out[:, 0, 0].sum()
    sq_sum = out[:, 0, 1].sum()
    return sp_sum / B + lmbda * (sq_sum / (B * D))


def distmult_loss_ref(h, r, t, y, *, lmbda=0.01):
    score = -jnp.sum(h * t * r, axis=-1)
    regul = jnp.mean(h ** 2) + jnp.mean(t ** 2) + jnp.mean(r ** 2)
    return jnp.mean(jax.nn.softplus(score * y)) + lmbda * regul


if __name__ == "__main__":
    LMBDA = 0.01
    keys = jax.random.split(jax.random.PRNGKey(0), 8)

    # Primary small case (B divisible by the tile -> no padding path).
    B, D = 16, 128
    h = jax.random.normal(keys[0], (B, D), dtype=jnp.float32)
    r = jax.random.normal(keys[1], (B, D), dtype=jnp.float32)
    t = jax.random.normal(keys[2], (B, D), dtype=jnp.float32)
    y = jnp.where(jax.random.bernoulli(keys[3], 0.5, (B,)), 1.0, -1.0).astype(jnp.float32)

    loss = jax.block_until_ready(distmult_loss(h, r, t, y, lmbda=LMBDA))
    ref = distmult_loss_ref(h, r, t, y, lmbda=LMBDA)
    assert jnp.allclose(loss, ref, rtol=1e-5, atol=1e-5), (loss, ref)

    # Ragged case: exercises the zero-padded + masked tail tile.
    B2, D2 = 20, 96
    h2 = jax.random.normal(keys[4], (B2, D2), dtype=jnp.float32)
    r2 = jax.random.normal(keys[5], (B2, D2), dtype=jnp.float32)
    t2 = jax.random.normal(keys[6], (B2, D2), dtype=jnp.float32)
    y2 = jnp.where(jax.random.bernoulli(keys[7], 0.5, (B2,)), 1.0, -1.0).astype(jnp.float32)

    loss2 = jax.block_until_ready(distmult_loss(h2, r2, t2, y2, lmbda=LMBDA))
    ref2 = distmult_loss_ref(h2, r2, t2, y2, lmbda=LMBDA)
    assert jnp.allclose(loss2, ref2, rtol=1e-5, atol=1e-5), (loss2, ref2)

    print("KERNEL_OK")
</pallas_src>

<mosaic_0001>
module attributes {stable_mosaic.version = 11 : i64} {
  func.func @_distmult_kernel(%arg0: i32, %arg1: i32, %arg2: memref<8x128xf32, #tpu.memory_space<vmem>>, %arg3: memref<8x128xf32, #tpu.memory_space<vmem>>, %arg4: memref<8x128xf32, #tpu.memory_space<vmem>>, %arg5: memref<16x1xf32, #tpu.memory_space<vmem>>, %arg6: memref<1x8x128xf32, #tpu.memory_space<vmem>>, %arg7: memref<8x128xf32, #tpu.memory_space<vmem>>, %arg8: memref<8x1xf32, #tpu.memory_space<vmem>>) attributes {dimension_semantics = [#tpu.dimension_semantics<parallel>, #tpu.dimension_semantics<arbitrary>], iteration_bounds = array<i64: 2, 1>, scalar_prefetch = 0 : i64, scratch_operands = 2 : i64, tpu.core_type = #tpu.core_type<tc>, window_params = [{transform_indices = @transform_0, window_bounds = array<i64: 8, 128>}, {transform_indices = @transform_1, window_bounds = array<i64: 8, 128>}, {transform_indices = @transform_2, window_bounds = array<i64: 8, 128>}, {pipeline_mode = #tpu.pipeline_mode<synchronous>, transform_indices = @transform_3, window_bounds = array<i64: 16, 1>}, {transform_indices = @transform_4, window_bounds = array<i64: 1, 8, 128>}]} {
    %c0_i32 = arith.constant 0 : i32
    %0 = arith.cmpi eq, %arg1, %c0_i32 : i32
    %1 = arith.extui %0 : i1 to i32
    %c0_i32_0 = arith.constant 0 : i32
    %2 = arith.cmpi ne, %1, %c0_i32_0 : i32
    scf.if %2 {
      %cst_22 = arith.constant 0.000000e+00 : f32
      %45 = vector.broadcast %cst_22 : f32 to vector<8x128xf32>
      %c0_23 = arith.constant 0 : index
      %c0_24 = arith.constant 0 : index
      %46 = vector.load %arg7[%c0_23, %c0_24] : memref<8x128xf32, #tpu.memory_space<vmem>>, vector<8x128xf32>
      tpu.vector_store %arg7[%c0_23, %c0_24], %45 {strides = array<i32>} : memref<8x128xf32, #tpu.memory_space<vmem>>, vector<8x128xf32>,
      %cst_25 = arith.constant 0.000000e+00 : f32
      %47 = vector.broadcast %cst_25 : f32 to vector<8x1xf32>
      %c0_26 = arith.constant 0 : index
      %c0_27 = arith.constant 0 : index
      %48 = vector.load %arg8[%c0_26, %c0_27] : memref<8x1xf32, #tpu.memory_space<vmem>>, vector<8x1xf32>
      tpu.vector_store %arg8[%c0_26, %c0_27], %47 {strides = array<i32>} : memref<8x1xf32, #tpu.memory_space<vmem>>, vector<8x1xf32>,
    } else {
    }
    %c0 = arith.constant 0 : index
    %c0_1 = arith.constant 0 : index
    %3 = vector.load %arg2[%c0, %c0_1] : memref<8x128xf32, #tpu.memory_space<vmem>>, vector<8x128xf32>
    %c0_2 = arith.constant 0 : index
    %c0_3 = arith.constant 0 : index
    %4 = vector.load %arg3[%c0_2, %c0_3] : memref<8x128xf32, #tpu.memory_space<vmem>>, vector<8x128xf32>
    %c0_4 = arith.constant 0 : index
    %c0_5 = arith.constant 0 : index
    %5 = vector.load %arg4[%c0_4, %c0_5] : memref<8x128xf32, #tpu.memory_space<vmem>>, vector<8x128xf32>
    %6 = arith.mulf %3, %3 : vector<8x128xf32>
    %7 = arith.mulf %5, %5 : vector<8x128xf32>
    %8 = arith.addf %6, %7 : vector<8x128xf32>
    %9 = arith.mulf %4, %4 : vector<8x128xf32>
    %10 = arith.addf %8, %9 : vector<8x128xf32>
    %c0_6 = arith.constant 0 : index
    %c0_7 = arith.constant 0 : index
    %11 = vector.load %arg7[%c0_6, %c0_7] : memref<8x128xf32, #tpu.memory_space<vmem>>, vector<8x128xf32>
    %12 = vector.shape_cast %10 : vector<8x128xf32> to vector<1x8x128xf32>
    %cst = arith.constant dense<0.000000e+00> : vector<8x128xf32>
    %13 = vector.multi_reduction <add>, %12, %cst [0] : vector<1x8x128xf32> to vector<8x128xf32>
    %14 = arith.addf %11, %13 : vector<8x128xf32>
    %c0_8 = arith.constant 0 : index
    %c0_9 = arith.constant 0 : index
    %15 = vector.load %arg7[%c0_8, %c0_9] : memref<8x128xf32, #tpu.memory_space<vmem>>, vector<8x128xf32>
    tpu.vector_store %arg7[%c0_8, %c0_9], %14 {strides = array<i32>} : memref<8x128xf32, #tpu.memory_space<vmem>>, vector<8x128xf32>,
    %16 = arith.mulf %3, %5 : vector<8x128xf32>
    %17 = arith.mulf %16, %4 : vector<8x128xf32>
    %cst_10 = arith.constant dense<0.000000e+00> : vector<8xf32>
    %18 = vector.multi_reduction <add>, %17, %cst_10 [1] : vector<8x128xf32> to vector<8xf32>
    %19 = vector.shape_cast %18 : vector<8xf32> to vector<8x1xf32>
    %cst_11 = arith.constant 0.000000e+00 : f32
    %20 = vector.broadcast %cst_11 : f32 to vector<8x1xf32>
    %21 = arith.subf %20, %19 : vector<8x1xf32>
    %c1_i32 = arith.constant 1 : i32
    %22 = arith.muli %arg0, %c1_i32 : i32
    %23 = arith.addi %22, %arg1 : i32
    %c8_i32 = arith.constant 8 : i32
    %24 = arith.muli %23, %c8_i32 : i32
    %25 = tpu.assume_multiple %24, 8 : i32
    %26 = arith.index_cast %25 : i32 to index
    %c0_12 = arith.constant 0 : index
    %27 = vector.load %arg5[%26, %c0_12] : memref<16x1xf32, #tpu.memory_space<vmem>>, vector<8x1xf32>
    %28 = arith.mulf %21, %27 : vector<8x1xf32>
    %cst_13 = arith.constant 0.000000e+00 : f32
    %29 = vector.broadcast %cst_13 : f32 to vector<8x1xf32>
    %30 = arith.maximumf %28, %29 : vector<8x1xf32>
    %31 = math.absf %28 : vector<8x1xf32>
    %cst_14 = arith.constant 0.000000e+00 : f32
    %32 = vector.broadcast %cst_14 : f32 to vector<8x1xf32>
    %33 = arith.subf %32, %31 : vector<8x1xf32>
    %34 = math.exp %33 : vector<8x1xf32>
    %35 = math.log1p %34 : vector<8x1xf32>
    %36 = arith.addf %30, %35 : vector<8x1xf32>
    %c0_15 = arith.constant 0 : index
    %c0_16 = arith.constant 0 : index
    %37 = vector.load %arg8[%c0_15, %c0_16] : memref<8x1xf32, #tpu.memory_space<vmem>>, vector<8x1xf32>
    %38 = vector.shape_cast %36 : vector<8x1xf32> to vector<1x8x1xf32>
    %cst_17 = arith.constant dense<0.000000e+00> : vector<8x1xf32>
    %39 = vector.multi_reduction <add>, %38, %cst_17 [0] : vector<1x8x1xf32> to vector<8x1xf32>
    %40 = arith.addf %37, %39 : vector<8x1xf32>
    %c0_18 = arith.constant 0 : index
    %c0_19 = arith.constant 0 : index
    %41 = vector.load %arg8[%c0_18, %c0_19] : memref<8x1xf32, #tpu.memory_space<vmem>>, vector<8x1xf32>
    tpu.vector_store %arg8[%c0_18, %c0_19], %40 {strides = array<i32>} : memref<8x1xf32, #tpu.memory_space<vmem>>, vector<8x1xf32>,
    %c0_i32_20 = arith.constant 0 : i32
    %42 = arith.cmpi eq, %arg1, %c0_i32_20 : i32
    %43 = arith.extui %42 : i1 to i32
    %c0_i32_21 = arith.constant 0 : i32
    %44 = arith.cmpi ne, %43, %c0_i32_21 : i32
    scf.if %44 {
      %c0_22 = arith.constant 0 : index
      %c0_23 = arith.constant 0 : index
      %45 = vector.load %arg8[%c0_22, %c0_23] : memref<8x1xf32, #tpu.memory_space<vmem>>, vector<8x1xf32>
      %46 = vector.shape_cast %45 : vector<8x1xf32> to vector<1x8x1xf32>
      %cst_24 = arith.constant dense<0.000000e+00> : vector<1xf32>
      %47 = vector.multi_reduction <add>, %46, %cst_24 [1, 2] : vector<1x8x1xf32> to vector<1xf32>
      %48 = vector.shape_cast %47 : vector<1xf32> to vector<1x1x1xf32>
      %49 = vector.extract %48[0, 0, 0] : f32 from vector<1x1x1xf32>
      %c0_25 = arith.constant 0 : index
      %c0_26 = arith.constant 0 : index
      %50 = vector.load %arg7[%c0_25, %c0_26] : memref<8x128xf32, #tpu.memory_space<vmem>>, vector<8x128xf32>
      %51 = vector.shape_cast %50 : vector<8x128xf32> to vector<1x8x128xf32>
      %cst_27 = arith.constant dense<0.000000e+00> : vector<1xf32>
      %52 = vector.multi_reduction <add>, %51, %cst_27 [1, 2] : vector<1x8x128xf32> to vector<1xf32>
      %53 = vector.shape_cast %52 : vector<1xf32> to vector<1x1x1xf32>
      %54 = vector.extract %53[0, 0, 0] : f32 from vector<1x1x1xf32>
      %55 = tpu.iota {dimensions = array<i32: 2>} : vector<1x8x128xi32>
      %c0_i32_28 = arith.constant 0 : i32
      %56 = vector.broadcast %c0_i32_28 : i32 to vector<1x8x128xi32>
      %57 = arith.cmpi eq, %55, %56 : vector<1x8x128xi32>
      %c1_i32_29 = arith.constant 1 : i32
      %58 = vector.broadcast %c1_i32_29 : i32 to vector<1x8x128xi32>
      %59 = arith.cmpi eq, %55, %58 : vector<1x8x128xi32>
      %cst_30 = arith.constant 0.000000e+00 : f32
      %60 = vector.broadcast %54 : f32 to vector<1x8x128xf32>
      %61 = vector.broadcast %cst_30 : f32 to vector<1x8x128xf32>
      %62 = arith.select %59, %60, %61 : vector<1x8x128xi1>, vector<1x8x128xf32>
      %63 = vector.broadcast %49 : f32 to vector<1x8x128xf32>
      %64 = arith.select %57, %63, %62 : vector<1x8x128xi1>, vector<1x8x128xf32>
      %c0_31 = arith.constant 0 : index
      %c0_32 = arith.constant 0 : index
      %c0_33 = arith.constant 0 : index
      %65 = vector.load %arg6[%c0_31, %c0_32, %c0_33] : memref<1x8x128xf32, #tpu.memory_space<vmem>>, vector<1x8x128xf32>
      tpu.vector_store %arg6[%c0_31, %c0_32, %c0_33], %64 {strides = array<i32>} : memref<1x8x128xf32, #tpu.memory_space<vmem>>, vector<1x8x128xf32>,
    } else {
    }
    return
  }
  func.func @transform_0(%arg0: i32, %arg1: i32) -> (i32, i32) {
    %c1_i32 = arith.constant 1 : i32
    %0 = arith.muli %arg0, %c1_i32 : i32
    %1 = arith.addi %0, %arg1 : i32
    %c0_i32 = arith.constant 0 : i32
    %c0_i32_0 = arith.constant 0 : i32
    return %1, %c0_i32 : i32, i32
  }
  func.func @transform_1(%arg0: i32, %arg1: i32) -> (i32, i32) {
    %c1_i32 = arith.constant 1 : i32
    %0 = arith.muli %arg0, %c1_i32 : i32
    %1 = arith.addi %0, %arg1 : i32
    %c0_i32 = arith.constant 0 : i32
    %c0_i32_0 = arith.constant 0 : i32
    return %1, %c0_i32 : i32, i32
  }
  func.func @transform_2(%arg0: i32, %arg1: i32) -> (i32, i32) {
    %c1_i32 = arith.constant 1 : i32
    %0 = arith.muli %arg0, %c1_i32 : i32
    %1 = arith.addi %0, %arg1 : i32
    %c0_i32 = arith.constant 0 : i32
    %c0_i32_0 = arith.constant 0 : i32
    return %1, %c0_i32 : i32, i32
  }
  func.func @transform_3(%arg0: i32, %arg1: i32) -> (i32, i32) {
    %c0_i32 = arith.constant 0 : i32
    %c0_i32_0 = arith.constant 0 : i32
    %c0_i32_1 = arith.constant 0 : i32
    return %c0_i32, %c0_i32_0 : i32, i32
  }
  func.func @transform_4(%arg0: i32, %arg1: i32) -> (i32, i32, i32) {
    %c0_i32 = arith.constant 0 : i32
    %c0_i32_0 = arith.constant 0 : i32
    %c0_i32_1 = arith.constant 0 : i32
    return %arg0, %c0_i32, %c0_i32_0 : i32, i32, i32
  }
}

</mosaic_0001>

<bundles_post_ra>
// kernel: tpu_custom_call.1
= control target key start
LH: loop header
LB: loop body
LE: loop exit
PB: predicated region body
PF: predicated region fallthrough
CT: control target
= control target key end

     0   :  { %9 = vsyncpa [#allocation5], 0  ;;  %s1016_s0 = inlined_call_operand.vmem [shape: f32[16,128], index: 0, kind: input, shape index: {}]   ;;  %s1017_s1 = inlined_call_operand.hbm [shape: f32[16,128], index: 1, kind: input, shape index: {}]   ;;  %s1018_s2 = inlined_call_operand.hbm [shape: f32[16,128], index: 2, kind: input, shape index: {}]   ;;  %s1019_s3 = inlined_call_operand.vmem [shape: f32[16,1], index: 3, kind: input, shape index: {}]   ;;  %s1020_s4 = inlined_call_operand.hbm [shape: f32[2,8,128], index: 4, kind: output, shape index: {}]  }
   0x1   :  { %11 = vsyncpa [#allocation5 + $0x1], 0 }
   0x2   :  { %12 = vsyncpa [#allocation8], 0 }
   0x3   :  { %14 = vsyncpa [#allocation8 + $0x1], 0 }
   0x4   :  { %15 = vsyncpa [#allocation6], 0 }
   0x5   :  { %17 = vsyncpa [#allocation6 + $0x1], 0  ;;  %s779_s15 = smov 0   ;;  %s781_s16 = smov 0  }
   0x6   :  { %s783_s17 = smov 0   ;;  %s785_s18 = smov 0  }
   0x7   :  { %s787_s19 = smov 0   ;;  %s789_s20 = smov 0  }
   0x8 LB: > { %s508_s21 = sadd.s32 4294967295, %s748_s20   ;;  %s509_s22 = sadd.s32 4294967294, %s748_s20   ;;  %s748_s20 = sphi %s789_s20, %s23_s20   ;;  %s744_s19 = sphi %s787_s19, %s1040_s19   ;;  %s740_s18 = sphi %s785_s18, %s1039_s18   ;;  %s736_s17 = sphi %s783_s17, %s1038_s17   ;;  %s732_s16 = sphi %s781_s16, %s1037_s16   ;;  %s728_s15 = sphi %s779_s15, %s1036_s15  }
   0x9   : > { %s35_s23 = sadd.s32 1, %s744_s19  ;;  %s72_s24 = sadd.s32 1, %s736_s17 }
   0xa   : > { %p37_p0 = scmp.ge.s32.totalorder %s35_s23, 2  ;;  %p79_p1 = scmp.ne.s32.totalorder %s736_s17, %s732_s16 }
   0xb   : > { %p80_p2 = scmp.eq.s32.totalorder %s748_s20, 0  ;;  %p85_p3 = scmp.ne.s32.totalorder %s732_s16, %s728_s15 }
   0xc   : > { %s1042_s23 = smov (%p37_p0, %s35_s23), 0  ;;  %p86_p5 = scmp.eq.s32.totalorder %s508_s21, 0 }
   0xd   : > { %p820_p4 = por %p80_p2, %p79_p1  ;;  %s69_s26 = ssub.s32 %s744_s19, %s1042_s23 }
   0xe   : > { %p158_p6 = scmp.eq.s32.totalorder %s508_s21, 1  ;;  %p70_p7 = scmp.eq.s32.totalorder %s69_s26, 0 }
   0xf   : > { %p826_p8 = por %p86_p5, %p85_p3  ;;  %p164_p10 = scmp.eq.s32.totalorder %s509_s22, 1 }
  0x10   : > { %p830_p9 = por %p158_p6, %p79_p1  ;;  %p547_p13 = scmp.lt.s32.totalorder %s748_s20, 2 }
  0x11   : > { %s1024_s27 = scalar_select %p826_p8, 1, 0 }
  0x12   : > { %s1025_s28 = scalar_select %p830_p9, 1, 0 }
  0x13   : > { %s835_s29 = scalar_select %p70_p7, %s736_s17, %s72_s24  }
  0x14   : > { %p837_p11 = por %p164_p10, %p85_p3  ;;  %s844_s5 = sand.u32 1, %s736_s17  }
  0x15   : > { %s512_s6 = sshll.u32 %s844_s5, 3  ;;  %s513_s7 = sshll.u32 %s744_s19, 7 }
  0x16   : > { %s1026_s30 = scalar_select %p837_p11, 1, 0 }
  0x17   : > { %s853_s10 = scalar_lea.hbm %s1017_s1, %s513_s7  ;;  %s200_s11 = scalar_lea.vmem [#allocation4], %s512_s6 }
  0x18   : > { %s208_s12 = sshll.u32 %s200_s11, 4  ;;  %p861_p0 = pnand %p547_p13, %p820_p4  ;;  %s857_s12 = int_to_ptr.vmem [resolvable:$true] %s208_s12 }
  0x19   : > { %s197_s14 = scalar_lea.sflag [#allocation5], %s844_s5  ;;  %s602_s21 = scalar_lea.hbm %s853_s10, 128 }
  0x1a   : > { %p603_p3 = scmp.ne.s32.totalorder %s853_s10, %s602_s21  ;;  %p604_p5 = pneg %p861_p0 }
  0x1b   : > { %s607_s25 = scalar_lea.hbm %s1017_s1, 256  ;;  %p608_p4 = scmp.lt.u32.totalorder %s853_s10, %s1017_s1 }
  0x1c   : > { %p605_p6 = pnand %p604_p5, %p603_p3  ;;  %p609_p10 = scmp.lt.u32.totalorder %s607_s25, %s602_s21 }
  0x1d   : > { %p611_p12 = scmp.lt.u32.totalorder %s602_s21, %s853_s10 }
  0x1e   : > { %p606_p7 = pneg %p605_p6  ;;  %p610_p13 = por %p609_p10, %p608_p4 }
  0x20   : > { %p612_p1 = por %p611_p12, %p610_p13 }
  0x22   : > { %p613_p2 = pnand %p612_p1, %p606_p7 }
  0x24   : > { %616 = shalt.err (!%p613_p2)
}
  0x25   : > { %s617_s9 = scalar_lea.vmem %s857_s12, 128  ;;  %s750_s11 = smov [#allocation4]  }
  0x26   : > { %p618_p3 = scmp.ne.s32.totalorder %s857_s12, %s617_s9  ;;  %s622_s22 = sshll.u32 %s750_s11, 4  ;;  %s623_s22 = int_to_ptr.vmem [resolvable:$false] %s622_s22 }
  0x27   : > { %s624_s24 = scalar_lea.vmem %s623_s22, 256  ;;  %p625_p9 = scmp.lt.s32.totalorder %s857_s12, %s623_s22 }
  0x28   : > { %p620_p6 = pnand %p618_p3, %p604_p5  ;;  %p626_p4 = scmp.lt.s32.totalorder %s624_s24, %s617_s9 }
  0x2a   : > { %p621_p11 = pneg %p620_p6  ;;  %p627_p10 = por %p626_p4, %p625_p9 }
  0x2c   : > { %p628_p12 = pnand %p627_p10, %p621_p11 }
  0x2e   : > { %631 = shalt.err (!%p628_p12)
}
  0x2f   : > { %539 = dma.hbm_to_vmem [thread:$0]  (!%p861_p0), %s853_s10, 128, %s857_s12, %s197_s14  }
  0x30   : > { %p1028_p1 = scmp.lt.s32.totalorder %s748_s20, 3  ;;  %p1029_p2 = scmp.ge.s32.totalorder %s748_s20, 1 }
  0x31   : > { %s906_s8 = scalar_lea.hbm %s1018_s2, %s513_s7  ;;  %s219_s9 = scalar_lea.vmem [#allocation7], %s512_s6 }
  0x32   : > { %p897_p7 = pnand %p1029_p2, %p1028_p1  ;;  %s227_s11 = sshll.u32 %s219_s9, 4  ;;  %s228_s11 = int_to_ptr.vmem [resolvable:$true] %s227_s11 }
  0x33   : > { %s216_s10 = scalar_lea.sflag [#allocation8], %s844_s5  ;;  %s632_s12 = scalar_lea.hbm %s906_s8, 128 }
  0x34   : > { %s1030_s21 = scalar_select %p897_p7, 1, 0 }
  0x35   : > { %p633_p9 = scmp.ne.s32.totalorder %s906_s8, %s632_s12  ;;  %s637_s7 = scalar_lea.hbm %s1018_s2, 256 }
  0x36   : > { %p638_p3 = scmp.lt.u32.totalorder %s906_s8, %s1018_s2  ;;  %p639_p6 = scmp.lt.u32.totalorder %s637_s7, %s632_s12 }
  0x37   : > { %p635_p11 = pnand %p633_p9, %p604_p5  ;;  %p641_p10 = scmp.lt.u32.totalorder %s632_s12, %s906_s8 }
  0x38   : > { %p640_p4 = por %p639_p6, %p638_p3 }
  0x39   : > { %p636_p13 = pneg %p635_p11 }
  0x3a   : > { %p642_p12 = por %p641_p10, %p640_p4 }
  0x3c   : > { %p643_p1 = pnand %p642_p12, %p636_p13 }
  0x3e   : > { %646 = shalt.err (!%p643_p1)
}
  0x3f   : > { %s647_s5 = scalar_lea.vmem %s228_s11, 128  ;;  %s751_s6 = smov [#allocation7]  }
  0x40   : > { %p648_p2 = scmp.ne.s32.totalorder %s228_s11, %s647_s5  ;;  %s652_s26 = sshll.u32 %s751_s6, 4  ;;  %s653_s26 = int_to_ptr.vmem [resolvable:$false] %s652_s26 }
  0x41   : > { %s654_s9 = scalar_lea.vmem %s653_s26, 256  ;;  %p655_p8 = scmp.lt.s32.totalorder %s228_s11, %s653_s26 }
  0x42   : > { %p650_p9 = pnand %p648_p2, %p604_p5  ;;  %p656_p7 = scmp.lt.s32.totalorder %s654_s9, %s647_s5 }
  0x44   : > { %p651_p11 = pneg %p650_p9  ;;  %p657_p3 = por %p656_p7, %p655_p8 }
  0x46   : > { %p658_p6 = pnand %p657_p3, %p651_p11 }
  0x48   : > { %661 = shalt.err (!%p658_p6)
}
  0x49   : > { %542 = dma.hbm_to_vmem [thread:$0]  (!%p861_p0), %s906_s8, 128, %s228_s11, %s216_s10  }
  0x4a   : > { %p1031_p13 = scmp.ne.s32.totalorder %s1030_s21, 0 }
  0x4b   : > { %s933_s12 = sand.u32 (!%p1031_p13), 1, %s732_s16   ;;  %p1032_p8 = scmp.ne.s32.totalorder (!%p1031_p13), %s1024_s27, 0 }
  0x4c   : > { %236 = sbr.rel (%p1031_p13) target bundleno = 511 (0x1ff), region = 36  ;;  %s936_s14 = sshll.u32 (!%p1031_p13), %s933_s12, 3 }
  0x4d   : > { %s239_s22 = scalar_lea.sflag (!%p1031_p13), [#allocation5], %s933_s12  ;;  %s242_s7 = scalar_lea.vmem (!%p1031_p13), [#allocation4], %s936_s14 }
  0x53   : > { %715 = dma.done.wait (%p1032_p8), %s239_s22, 128  }
  0x54   : > { %717 = vsyncadd (%p1032_p8), %s239_s22, 4294967168  ;;  %s248_s13 = scalar_lea.sflag [#allocation8], %s933_s12  ;;  %s251_s21 = scalar_lea.vmem [#allocation7], %s936_s14 }
  0x55   : > { %719 = dma.done.wait (%p1032_p8), %s248_s13, 128  }
  0x56   : > { %721 = vsyncadd (%p1032_p8), %s248_s13, 4294967168  ;;  %p287_p0 = scmp.lt.s32.totalorder %s740_s18, 1  ;;  %v302_v1 = vld [vmem:[%s242_s7] sm:$0xff]  ;;  %v303_v2 = vld [vmem:[%s251_s21] sm:$0xff]  ;;  %vm299_vm0 = vcmask 7168   ;;  %v752_v5 = vmov 0.0   ;;  %v367_v47 = vlaneseq }
  0x57   : > { %300 = vst.msk [vmem:[#allocation3] sm:$0xff] %vm299_vm0, %v752_v5  ;;  %v305_v7 = vmul.f32 %v303_v2, %v303_v2  ;;  %v307_v8 = vmul.f32 %v302_v1, %v302_v1  ;;  %s521_s27 = sshll.u32 %s740_s18, 3  ;;  %s523_s9 = sshll.u32 %s740_s18, 7 }
  0x58   : > { %s288_s8 = scalar_select %p287_p0, %s740_s18, 1  ;;  %v368_v48 = vand.u32 127, %v367_v47 }
  0x59   : > { %s320_s26 = scalar_lea.vmem %s1019_s3, %s521_s27  ;;  %s285_s7 = scalar_lea.vmem [#allocation9], %s936_s14 }
  0x5a   : > { %s520_s11 = sshll.u32 %s288_s8, 3  ;;  %v321_v11 = vld [vmem:[%s320_s26] sm:$0xff]  ;;  %vm370_vm2 = vcmp.eq.s32.totalorder %v368_v48, 1  ;;  %s390_s13 = sshll.u32 %s285_s7, 4  ;;  %vm369_vm3 = vcmp.eq.s32.totalorder %v368_v48, 0  ;;  %s969_s13 = int_to_ptr.vmem [resolvable:$true] %s390_s13 }
  0x5b   : > { %s290_s25 = scalar_lea.vmem %s1016_s0, %s520_s11  ;;  %s967_s10 = scalar_lea.hbm %s1020_s4, %s523_s9 }
  0x5c   : > { %v301_v0 = vld [vmem:[%s290_s25] sm:$0xff]  ;;  %s377_s18 = scalar_lea.sflag [#allocation6], %s933_s12  ;;  %s662_s14 = scalar_lea.vmem %s969_s13, 128 }
  0x5d   : > { %v313_v3 = vmul.f32 %v303_v2, %v301_v0  ;;  %v304_v6 = vmul.f32 %v301_v0, %v301_v0  ;;  %p663_p5 = scmp.ne.s32.totalorder %s969_s13, %s662_s14  ;;  %p1033_p7 = scmp.ne.s32.totalorder %s1025_s28, 0 }
  0x5e   : > { %v338_v28 = vld [vmem:[#allocation3] sm:$0xff]  ;;  %s753_s24 = smov [#allocation9]  }
  0x5f   : > { %v314_v4 = vmul.f32 %v313_v3, %v302_v1  ;;  %v306_v9 = vadd.f32 %v305_v7, %v304_v6  ;;  %p664_p4 = pnand %p663_p5, %p1033_p7  ;;  %s666_s25 = sshll.u32 %s753_s24, 4  ;;  %s667_s25 = int_to_ptr.vmem [resolvable:$false] %s666_s25 }
  0x60   : > { %s668_s27 = scalar_lea.vmem %s667_s25, 256  ;;  %p669_p12 = scmp.lt.s32.totalorder %s969_s13, %s667_s25 }
  0x61   : > { %315 = vadd.xlane.f32.xlu0 %v314_v4  ;;  %v308_v10 = vadd.f32 %v307_v8, %v306_v9  ;;  %p665_p10 = pneg %p664_p4  ;;  %p670_p1 = scmp.lt.s32.totalorder %s668_s27, %s662_s14 }
  0x63   : > { %358 = vadd.xlane.f32.xlu1 %v308_v10  ;;  %p671_p2 = por %p670_p1, %p669_p12 }
  0x65   : > { %p672_p9 = pnand %p671_p2, %p665_p10 }
  0xee   : > { %v316_v12 = vpop.xlane.xlu0 %315 }
  0xef   : > { %v317_v13 = vsub.f32 0.0, %v316_v12 }
  0xf0   : > { %v359_v33 = vpop.xlane.xlu1 %358 }
  0xf1   : > { %v322_v14 = vmul.f32 %v321_v11, %v317_v13  ;;  %v360_v34 = vrot.slane %v359_v33, 4 }
  0xf3   : > { %v324_v15 = vand.u32 2147483647, %v322_v14  ;;  %v323_v26 = vmax.f32 %v322_v14, 0.0  ;;  %v361_v35 = vadd.f32 %v360_v34, %v359_v33 }
  0xf5   : > { %v325_v16 = vsub.f32 0.0, %v324_v15  ;;  %v362_v36 = vrot.slane %v361_v35, 2 }
  0xf7   : > { %v326_v17 = vmul.f32 1.442695, %v325_v16  ;;  %v363_v40 = vadd.f32 %v362_v36, %v361_v35 }
  0xf9   : > { %598 = vpow2.f32 %v326_v17  ;;  %v364_v43 = vrot.slane %v363_v40, 1 }
  0xfb   : > { %v365_v46 = vadd.f32 %v364_v43, %v363_v40 }
 0x103   : > { %v599_v18 = vpop.eup %598 }
 0x104   : > { %v328_v19 = vadd.f32 1.0, %v599_v18  ;;  %v331_v20 = vmul.f32 -0.5, %v599_v18  ;;  %v334_v22 = vand.u32 2147483647, %v599_v18 }
 0x106   : > { %600 = vlog2.f32 %v328_v19  ;;  %v332_v21 = vadd.f32 1.0, %v331_v20  ;;  %vm335_vm1 = vcmp.lt.f32.partialorder %v334_v22, 0.0004427343 }
 0x108   : > { %v333_v25 = vmul.f32 %v599_v18, %v332_v21 }
 0x110   : > { %v601_v23 = vpop.eup %600 }
 0x111   : > { %v330_v24 = vmul.f32 0.6931472, %v601_v23 }
 0x113   : > { %v336_v27 = vsel %vm335_vm1, %v333_v25, %v330_v24 }
 0x114   : > { %v337_v29 = vadd.f32 %v336_v27, %v323_v26 }
 0x116   : > { %v340_v30 = vadd.f32 %v338_v28, %v337_v29 }
 0x118   : > { %342 = vst.msk [vmem:[#allocation3] sm:$0xff] %vm299_vm0, %v340_v30 }
 0x11f   : > { %v346_v31 = vld [vmem:[#allocation3] sm:$0xff] }
 0x120   : > { %v347_v32 = vsel %vm299_vm0, %v346_v31, 0.0 }
 0x121   : > { %348 = vadd.xlane.f32.xlu0 %v347_v32 }
 0x1ae   : > { %v349_v37 = vpop.xlane.xlu0 %348 }
 0x1af   : > { %v350_v38 = vrot.slane %v349_v37, 4 }
 0x1b1   : > { %v351_v39 = vadd.f32 %v350_v38, %v349_v37 }
 0x1b3   : > { %v352_v41 = vrot.slane %v351_v39, 2 }
 0x1b5   : > { %v353_v42 = vadd.f32 %v352_v41, %v351_v39 }
 0x1b7   : > { %v354_v44 = vrot.slane %v353_v42, 1 }
 0x1b9   : > { %v355_v45 = vadd.f32 %v354_v44, %v353_v42 }
 0x1bb   : > { %526 = vpush %v355_v45 }
 0x1bc   : > { %528 = vpush %v365_v46 }
 0x1ec   : > { %s527_s22 = spop %526 }
 0x1ed   : > { %v373_v49 = vstv %s527_s22  ;;  %s529_s21 = spop %528 }
 0x1ee   : > { %v371_v50 = vstv %s529_s21 }
 0x1ef   : > { %v372_v51 = vsel %vm370_vm2, %v371_v50, 0.0 }
 0x1f0   : > { %v374_v52 = vsel %vm369_vm3, %v373_v49, %v372_v51 }
 0x1f1   : > { %375 = vst [vmem:[%s285_s7] sm:$0xff] %v374_v52 }
 0x1f2   : > { %675 = shalt.err (!%p672_p9)
}
 0x1f3   : > { %s676_s12 = scalar_lea.hbm %s967_s10, 128  ;;  %s680_s26 = scalar_lea.hbm %s1020_s4, 256 }
 0x1f4   : > { %p677_p11 = scmp.ne.s32.totalorder %s967_s10, %s676_s12  ;;  %p681_p13 = scmp.lt.u32.totalorder %s967_s10, %s1020_s4 }
 0x1f5   : > { %p682_p8 = scmp.lt.u32.totalorder %s680_s26, %s676_s12  ;;  %p684_p5 = scmp.lt.u32.totalorder %s676_s12, %s967_s10 }
 0x1f6   : > { %p678_p3 = pnand %p677_p11, %p1033_p7 }
 0x1f7   : > { %p683_p0 = por %p682_p8, %p681_p13 }
 0x1f8   : > { %p679_p6 = pneg %p678_p3 }
 0x1f9   : > { %p685_p4 = por %p684_p5, %p683_p0 }
 0x1fb   : > { %p686_p10 = pnand %p685_p4, %p679_p6 }
 0x1fd   : > { %689 = shalt.err (!%p686_p10)
}
 0x1fe   : > { %534 = dma.vmem_to_hbm [thread:$0]  (%p1033_p7), %s969_s13, 128, %s967_s10, %s377_s18  }
 0x1ff PF: > { %s402_s7 = sand.u32 1, %s728_s15   ;;  %p1034_p12 = scmp.ne.s32.totalorder %s1026_s30, 0 }
 0x200   : > { %p1035_p1 = scmp.ge.s32.totalorder %s748_s20, 2  ;;  %s403_s21 = scalar_lea.sflag [#allocation6], %s402_s7 }
 0x202   : > { %p544_p2 = pnand %p1035_p1, %p1034_p12 }
 0x204   : > { %723 = dma.done.wait (!%p544_p2), %s403_s21, 128  }
 0x205   : > { %725 = vsyncadd (!%p544_p2), %s403_s21, 4294967168  ;;  %s23_s20 = sadd.s32 1, %s748_s20   ;;  %s1036_s15 = smov %s732_s16 }
 0x206   : > { %p20_p9 = scmp.ge.s32.totalorder %s23_s20, 4   ;;  %s1037_s16 = smov %s736_s17 }
 0x207   : > { %s1038_s17 = smov %s835_s29  ;;  %s1039_s18 = smov %s744_s19 }
 0x208   : > { %s1040_s19 = smov %s1042_s23  ;;  %22 = sbr.rel (!%p20_p9) target bundleno = 8 (0x8), region = 106 }
 0x20f   :  { %408 = vsyncpa [#allocation5], 1 }
 0x210   :  { %410 = vsyncpa [#allocation5 + $0x1], 1 }
 0x211   :  { %411 = vsyncpa [#allocation8], 1 }
 0x212   :  { %413 = vsyncpa [#allocation8 + $0x1], 1 }
 0x213   :  { %414 = vsyncpa [#allocation6], 1 }
 0x214   :  { %416 = vsyncpa [#allocation6 + $0x1], 1 }

</bundles_post_ra>
